<compile_context>
chip_gen: v5e
topology: v5e:2x2
jax: 0.10.0
libtpu: 0.0.40
codegen_flags: <defaults>
</compile_context>

<pallas_src>
import jax
import jax.numpy as jnp
import numpy as np
from jax import lax
from jax.experimental import pallas as pl
from jax.experimental.pallas import tpu as pltpu


def _round_up(x, m):
    return (x + m - 1) // m * m


def _make_conv_kernel(tap_offsets, chunks):
    """Kernel factory: tap offsets / chunk bounds are static Python ints."""

    def kernel(w_ref, x_ref, b_ref, o_ref):
        # w_ref: (K*K, Cout_p, Cin) bf16  per-tap weight matrices (resident)
        # x_ref: (1, Cin, Lx)       bf16  flattened padded image, one batch element
        # b_ref: (Cout_p, 1)        f32   bias column (resident)
        # o_ref: (1, Cout_p, P_pad) bf16  dense channel-major, lane-dense output
        bias = b_ref[...]
        for c0, width in chunks:                      # static in-kernel spatial tiling
            acc = None
            for t, off in enumerate(tap_offsets):     # K*K shift-and-matmul taps
                tap = x_ref[0, :, c0 + off:c0 + off + width]          # (Cin, width)
                part = jnp.dot(w_ref[t], tap,
                               preferred_element_type=jnp.float32)    # (Cout_p, width)
                acc = part if acc is None else acc + part
            o_ref[0, :, c0:c0 + width] = (acc + bias).astype(o_ref.dtype)

    return kernel


def conv_layer_forward(x_nchw, weight_oihw, bias, *, kernel_size, stride,
                       out_dtype=jnp.bfloat16, lane_chunk=4096):
    """ReflectionPad2d(k//2) + Conv2d(k, stride), matching the PyTorch ConvLayer."""
    K = kernel_size
    pad = K // 2
    N, Cin, H, W = x_nchw.shape
    Cout = weight_oihw.shape[0]
    if pad >= H or pad >= W:
        raise ValueError("ReflectionPad2d requires pad < spatial size")

    # --- wrapper-side index plumbing: reflection pad + flatten (1x activation pass) ---
    x = x_nchw.astype(jnp.bfloat16)
    xp = jnp.pad(x, ((0, 0), (0, 0), (pad, pad), (pad, pad)), mode="reflect")
    Hp, Wp = H + 2 * pad, W + 2 * pad
    Ho = (Hp - K) // stride + 1
    Wo = (Wp - K) // stride + 1
    Hd = Hp - K + 1                       # dense (stride-1) output rows
    P_dense = Hd * Wp                     # dense output, Wp-wide rows (cropped later)
    P_pad = _round_up(max(P_dense, 128), 128)
    max_off = (K - 1) * Wp + (K - 1)
    Lx = _round_up(P_pad + max_off, 128)  # so every tap slice stays in bounds

    xflat = xp.reshape(N, Cin, Hp * Wp)
    xflat = jnp.pad(xflat, ((0, 0), (0, 0), (0, Lx - Hp * Wp)))

    # Weights as K*K per-tap (Cout_p, Cin) matrices; no contraction-dim zero padding.
    Cout_p = _round_up(Cout, 16)          # bf16 sublane packing
    w_taps = jnp.transpose(weight_oihw, (2, 3, 0, 1)).reshape(K * K, Cout, Cin)
    w_taps = jnp.pad(w_taps, ((0, 0), (0, Cout_p - Cout), (0, 0))).astype(jnp.bfloat16)
    b_col = jnp.pad(bias, (0, Cout_p - Cout)).reshape(Cout_p, 1).astype(jnp.float32)

    tap_offsets = tuple(kh * Wp + kw for kh in range(K) for kw in range(K))
    chunk = min(_round_up(lane_chunk, 128), P_pad)
    chunks = tuple((c0, min(chunk, P_pad - c0)) for c0 in range(0, P_pad, chunk))

    out_isize = jnp.dtype(out_dtype).itemsize
    cost = pl.CostEstimate(
        flops=2 * N * K * K * Cin * Cout_p * P_pad,
        transcendentals=0,
        bytes_accessed=(2 * N * Cin * Lx + 2 * K * K * Cout_p * Cin + 4 * Cout_p
                        + N * Cout_p * P_pad * out_isize),
    )

    out = pl.pallas_call(
        _make_conv_kernel(tap_offsets, chunks),
        out_shape=jax.ShapeDtypeStruct((N, Cout_p, P_pad), out_dtype),
        grid_spec=pltpu.PrefetchScalarGridSpec(
            num_scalar_prefetch=0,
            grid=(N,),
            in_specs=[
                pl.BlockSpec((K * K, Cout_p, Cin), lambda n: (0, 0, 0)),
                pl.BlockSpec((1, Cin, Lx), lambda n: (n, 0, 0)),
                pl.BlockSpec((Cout_p, 1), lambda n: (0, 0)),
            ],
            out_specs=pl.BlockSpec((1, Cout_p, P_pad), lambda n: (n, 0, 0)),
        ),
        compiler_params=pltpu.CompilerParams(
            dimension_semantics=("parallel",),
            vmem_limit_bytes=48 * 1024 * 1024,
        ),
        cost_estimate=cost,
    )(w_taps, xflat, b_col)

    # Dense channel-major result: crop padding, un-flatten, subsample for the stride.
    out = out[:, :Cout, :P_dense].reshape(N, Cout, Hd, Wp)
    out = out[:, :, :(Ho - 1) * stride + 1:stride, :(Wo - 1) * stride + 1:stride]
    return out


def _reference_conv(x_nchw, weight_oihw, bias, *, kernel_size, stride):
    """Plain-JAX reference (same bf16-rounded inputs, f32 accumulation)."""
    pad = kernel_size // 2
    x = x_nchw.astype(jnp.bfloat16).astype(jnp.float32)
    w = weight_oihw.astype(jnp.bfloat16).astype(jnp.float32)
    xp = jnp.pad(x, ((0, 0), (0, 0), (pad, pad), (pad, pad)), mode="reflect")
    out = lax.conv_general_dilated(
        xp, w,
        window_strides=(stride, stride),
        padding="VALID",
        dimension_numbers=("NCHW", "OIHW", "NCHW"),
        preferred_element_type=jnp.float32,
        precision=lax.Precision.HIGHEST,
    )
    return out + bias.reshape(1, -1, 1, 1)


if __name__ == "__main__":
    in_channels, out_channels = 4, 8
    kernel_size = 3

    key = jax.random.PRNGKey(0)
    kx, kw, kb = jax.random.split(key, 3)

    fan_in = in_channels * kernel_size * kernel_size
    bound = 1.0 / np.sqrt(fan_in)
    weight = jax.random.uniform(
        kw, (out_channels, in_channels, kernel_size, kernel_size),
        minval=-bound, maxval=bound, dtype=jnp.float32)
    bias = jax.random.uniform(
        kb, (out_channels,), minval=-bound, maxval=bound, dtype=jnp.float32)

    x = jax.random.normal(kx, (2, in_channels, 16, 16), dtype=jnp.float32)

    # stride = 1 (first / residual ConvLayers)
    out1 = conv_layer_forward(x, weight, bias, kernel_size=kernel_size, stride=1)
    out1 = jax.block_until_ready(out1)
    ref1 = _reference_conv(x, weight, bias, kernel_size=kernel_size, stride=1)
    np.testing.assert_allclose(np.asarray(out1.astype(jnp.float32)),
                               np.asarray(ref1), rtol=2e-2, atol=2e-2)

    # stride = 2 (downsampling ConvLayers)
    out2 = conv_layer_forward(x, weight, bias, kernel_size=kernel_size, stride=2)
    out2 = jax.block_until_ready(out2)
    ref2 = _reference_conv(x, weight, bias, kernel_size=kernel_size, stride=2)
    np.testing.assert_allclose(np.asarray(out2.astype(jnp.float32)),
                               np.asarray(ref2), rtol=2e-2, atol=2e-2)

    print("KERNEL_OK")
</pallas_src>

<mosaic_0001>
module attributes {stable_mosaic.version = 11 : i64} {
  func.func @kernel(%arg0: i32, %arg1: memref<9x16x4xbf16, #tpu.memory_space<vmem>>, %arg2: memref<1x4x512xbf16, #tpu.memory_space<vmem>>, %arg3: memref<16x1xf32, #tpu.memory_space<vmem>>, %arg4: memref<1x16x384xbf16, #tpu.memory_space<vmem>>) attributes {dimension_semantics = [#tpu.dimension_semantics<parallel>], iteration_bounds = array<i64: 2>, scalar_prefetch = 0 : i64, scratch_operands = 0 : i64, tpu.core_type = #tpu.core_type<tc>, window_params = [{pipeline_mode = #tpu.pipeline_mode<synchronous>, transform_indices = @transform_0, window_bounds = array<i64: 9, 16, 4>}, {transform_indices = @transform_1, window_bounds = array<i64: 1, 4, 512>}, {pipeline_mode = #tpu.pipeline_mode<synchronous>, transform_indices = @transform_2, window_bounds = array<i64: 16, 1>}, {transform_indices = @transform_3, window_bounds = array<i64: 1, 16, 384>}]} {
    %c0 = arith.constant 0 : index
    %c0_0 = arith.constant 0 : index
    %0 = vector.load %arg3[%c0, %c0_0] : memref<16x1xf32, #tpu.memory_space<vmem>>, vector<16x1xf32>
    %c0_1 = arith.constant 0 : index
    %c0_2 = arith.constant 0 : index
    %c0_3 = arith.constant 0 : index
    %1 = vector.load %arg2[%c0_1, %c0_2, %c0_3] : memref<1x4x512xbf16, #tpu.memory_space<vmem>>, vector<1x4x384xbf16>
    %2 = vector.shape_cast %1 : vector<1x4x384xbf16> to vector<4x384xbf16>
    %c0_4 = arith.constant 0 : index
    %c0_5 = arith.constant 0 : index
    %c0_6 = arith.constant 0 : index
    %3 = vector.load %arg1[%c0_4, %c0_5, %c0_6] : memref<9x16x4xbf16, #tpu.memory_space<vmem>>, vector<1x16x4xbf16>
    %4 = vector.shape_cast %3 : vector<1x16x4xbf16> to vector<16x4xbf16>
    %cst = arith.constant dense<0.000000e+00> : vector<16x384xf32>
    %5 = tpu.matmul %4, %2, %cst {dimension_numbers = #tpu.dot_dimension_numbers<[1], [0], [0], [1], [0, 0, 1, 1], [], []>} : vector<16x4xbf16>, vector<4x384xbf16>, vector<16x384xf32> -> vector<16x384xf32>
    %c0_7 = arith.constant 0 : index
    %c0_8 = arith.constant 0 : index
    %c1 = arith.constant 1 : index
    %6 = vector.load %arg2[%c0_7, %c0_8, %c1] : memref<1x4x512xbf16, #tpu.memory_space<vmem>>, vector<1x4x384xbf16>
    %7 = vector.shape_cast %6 : vector<1x4x384xbf16> to vector<4x384xbf16>
    %c1_9 = arith.constant 1 : index
    %c0_10 = arith.constant 0 : index
    %c0_11 = arith.constant 0 : index
    %8 = vector.load %arg1[%c1_9, %c0_10, %c0_11] : memref<9x16x4xbf16, #tpu.memory_space<vmem>>, vector<1x16x4xbf16>
    %9 = vector.shape_cast %8 : vector<1x16x4xbf16> to vector<16x4xbf16>
    %cst_12 = arith.constant dense<0.000000e+00> : vector<16x384xf32>
    %10 = tpu.matmul %9, %7, %cst_12 {dimension_numbers = #tpu.dot_dimension_numbers<[1], [0], [0], [1], [0, 0, 1, 1], [], []>} : vector<16x4xbf16>, vector<4x384xbf16>, vector<16x384xf32> -> vector<16x384xf32>
    %11 = arith.addf %5, %10 : vector<16x384xf32>
    %c0_13 = arith.constant 0 : index
    %c0_14 = arith.constant 0 : index
    %c2 = arith.constant 2 : index
    %12 = vector.load %arg2[%c0_13, %c0_14, %c2] : memref<1x4x512xbf16, #tpu.memory_space<vmem>>, vector<1x4x384xbf16>
    %13 = vector.shape_cast %12 : vector<1x4x384xbf16> to vector<4x384xbf16>
    %c2_15 = arith.constant 2 : index
    %c0_16 = arith.constant 0 : index
    %c0_17 = arith.constant 0 : index
    %14 = vector.load %arg1[%c2_15, %c0_16, %c0_17] : memref<9x16x4xbf16, #tpu.memory_space<vmem>>, vector<1x16x4xbf16>
    %15 = vector.shape_cast %14 : vector<1x16x4xbf16> to vector<16x4xbf16>
    %cst_18 = arith.constant dense<0.000000e+00> : vector<16x384xf32>
    %16 = tpu.matmul %15, %13, %cst_18 {dimension_numbers = #tpu.dot_dimension_numbers<[1], [0], [0], [1], [0, 0, 1, 1], [], []>} : vector<16x4xbf16>, vector<4x384xbf16>, vector<16x384xf32> -> vector<16x384xf32>
    %17 = arith.addf %11, %16 : vector<16x384xf32>
    %c0_19 = arith.constant 0 : index
    %c0_20 = arith.constant 0 : index
    %c18 = arith.constant 18 : index
    %18 = vector.load %arg2[%c0_19, %c0_20, %c18] : memref<1x4x512xbf16, #tpu.memory_space<vmem>>, vector<1x4x384xbf16>
    %19 = vector.shape_cast %18 : vector<1x4x384xbf16> to vector<4x384xbf16>
    %c3 = arith.constant 3 : index
    %c0_21 = arith.constant 0 : index
    %c0_22 = arith.constant 0 : index
    %20 = vector.load %arg1[%c3, %c0_21, %c0_22] : memref<9x16x4xbf16, #tpu.memory_space<vmem>>, vector<1x16x4xbf16>
    %21 = vector.shape_cast %20 : vector<1x16x4xbf16> to vector<16x4xbf16>
    %cst_23 = arith.constant dense<0.000000e+00> : vector<16x384xf32>
    %22 = tpu.matmul %21, %19, %cst_23 {dimension_numbers = #tpu.dot_dimension_numbers<[1], [0], [0], [1], [0, 0, 1, 1], [], []>} : vector<16x4xbf16>, vector<4x384xbf16>, vector<16x384xf32> -> vector<16x384xf32>
    %23 = arith.addf %17, %22 : vector<16x384xf32>
    %c0_24 = arith.constant 0 : index
    %c0_25 = arith.constant 0 : index
    %c19 = arith.constant 19 : index
    %24 = vector.load %arg2[%c0_24, %c0_25, %c19] : memref<1x4x512xbf16, #tpu.memory_space<vmem>>, vector<1x4x384xbf16>
    %25 = vector.shape_cast %24 : vector<1x4x384xbf16> to vector<4x384xbf16>
    %c4 = arith.constant 4 : index
    %c0_26 = arith.constant 0 : index
    %c0_27 = arith.constant 0 : index
    %26 = vector.load %arg1[%c4, %c0_26, %c0_27] : memref<9x16x4xbf16, #tpu.memory_space<vmem>>, vector<1x16x4xbf16>
    %27 = vector.shape_cast %26 : vector<1x16x4xbf16> to vector<16x4xbf16>
    %cst_28 = arith.constant dense<0.000000e+00> : vector<16x384xf32>
    %28 = tpu.matmul %27, %25, %cst_28 {dimension_numbers = #tpu.dot_dimension_numbers<[1], [0], [0], [1], [0, 0, 1, 1], [], []>} : vector<16x4xbf16>, vector<4x384xbf16>, vector<16x384xf32> -> vector<16x384xf32>
    %29 = arith.addf %23, %28 : vector<16x384xf32>
    %c0_29 = arith.constant 0 : index
    %c0_30 = arith.constant 0 : index
    %c20 = arith.constant 20 : index
    %30 = vector.load %arg2[%c0_29, %c0_30, %c20] : memref<1x4x512xbf16, #tpu.memory_space<vmem>>, vector<1x4x384xbf16>
    %31 = vector.shape_cast %30 : vector<1x4x384xbf16> to vector<4x384xbf16>
    %c5 = arith.constant 5 : index
    %c0_31 = arith.constant 0 : index
    %c0_32 = arith.constant 0 : index
    %32 = vector.load %arg1[%c5, %c0_31, %c0_32] : memref<9x16x4xbf16, #tpu.memory_space<vmem>>, vector<1x16x4xbf16>
    %33 = vector.shape_cast %32 : vector<1x16x4xbf16> to vector<16x4xbf16>
    %cst_33 = arith.constant dense<0.000000e+00> : vector<16x384xf32>
    %34 = tpu.matmul %33, %31, %cst_33 {dimension_numbers = #tpu.dot_dimension_numbers<[1], [0], [0], [1], [0, 0, 1, 1], [], []>} : vector<16x4xbf16>, vector<4x384xbf16>, vector<16x384xf32> -> vector<16x384xf32>
    %35 = arith.addf %29, %34 : vector<16x384xf32>
    %c0_34 = arith.constant 0 : index
    %c0_35 = arith.constant 0 : index
    %c36 = arith.constant 36 : index
    %36 = vector.load %arg2[%c0_34, %c0_35, %c36] : memref<1x4x512xbf16, #tpu.memory_space<vmem>>, vector<1x4x384xbf16>
    %37 = vector.shape_cast %36 : vector<1x4x384xbf16> to vector<4x384xbf16>
    %c6 = arith.constant 6 : index
    %c0_36 = arith.constant 0 : index
    %c0_37 = arith.constant 0 : index
    %38 = vector.load %arg1[%c6, %c0_36, %c0_37] : memref<9x16x4xbf16, #tpu.memory_space<vmem>>, vector<1x16x4xbf16>
    %39 = vector.shape_cast %38 : vector<1x16x4xbf16> to vector<16x4xbf16>
    %cst_38 = arith.constant dense<0.000000e+00> : vector<16x384xf32>
    %40 = tpu.matmul %39, %37, %cst_38 {dimension_numbers = #tpu.dot_dimension_numbers<[1], [0], [0], [1], [0, 0, 1, 1], [], []>} : vector<16x4xbf16>, vector<4x384xbf16>, vector<16x384xf32> -> vector<16x384xf32>
    %41 = arith.addf %35, %40 : vector<16x384xf32>
    %c0_39 = arith.constant 0 : index
    %c0_40 = arith.constant 0 : index
    %c37 = arith.constant 37 : index
    %42 = vector.load %arg2[%c0_39, %c0_40, %c37] : memref<1x4x512xbf16, #tpu.memory_space<vmem>>, vector<1x4x384xbf16>
    %43 = vector.shape_cast %42 : vector<1x4x384xbf16> to vector<4x384xbf16>
    %c7 = arith.constant 7 : index
    %c0_41 = arith.constant 0 : index
    %c0_42 = arith.constant 0 : index
    %44 = vector.load %arg1[%c7, %c0_41, %c0_42] : memref<9x16x4xbf16, #tpu.memory_space<vmem>>, vector<1x16x4xbf16>
    %45 = vector.shape_cast %44 : vector<1x16x4xbf16> to vector<16x4xbf16>
    %cst_43 = arith.constant dense<0.000000e+00> : vector<16x384xf32>
    %46 = tpu.matmul %45, %43, %cst_43 {dimension_numbers = #tpu.dot_dimension_numbers<[1], [0], [0], [1], [0, 0, 1, 1], [], []>} : vector<16x4xbf16>, vector<4x384xbf16>, vector<16x384xf32> -> vector<16x384xf32>
    %47 = arith.addf %41, %46 : vector<16x384xf32>
    %c0_44 = arith.constant 0 : index
    %c0_45 = arith.constant 0 : index
    %c38 = arith.constant 38 : index
    %48 = vector.load %arg2[%c0_44, %c0_45, %c38] : memref<1x4x512xbf16, #tpu.memory_space<vmem>>, vector<1x4x384xbf16>
    %49 = vector.shape_cast %48 : vector<1x4x384xbf16> to vector<4x384xbf16>
    %c8 = arith.constant 8 : index
    %c0_46 = arith.constant 0 : index
    %c0_47 = arith.constant 0 : index
    %50 = vector.load %arg1[%c8, %c0_46, %c0_47] : memref<9x16x4xbf16, #tpu.memory_space<vmem>>, vector<1x16x4xbf16>
    %51 = vector.shape_cast %50 : vector<1x16x4xbf16> to vector<16x4xbf16>
    %cst_48 = arith.constant dense<0.000000e+00> : vector<16x384xf32>
    %52 = tpu.matmul %51, %49, %cst_48 {dimension_numbers = #tpu.dot_dimension_numbers<[1], [0], [0], [1], [0, 0, 1, 1], [], []>} : vector<16x4xbf16>, vector<4x384xbf16>, vector<16x384xf32> -> vector<16x384xf32>
    %53 = arith.addf %47, %52 : vector<16x384xf32>
    %54 = vector.broadcast %0 : vector<16x1xf32> to vector<16x384xf32>
    %55 = arith.addf %53, %54 : vector<16x384xf32>
    %56 = arith.truncf %55 : vector<16x384xf32> to vector<16x384xbf16>
    %c0_49 = arith.constant 0 : index
    %c0_50 = arith.constant 0 : index
    %c0_51 = arith.constant 0 : index
    %57 = vector.load %arg4[%c0_49, %c0_50, %c0_51] : memref<1x16x384xbf16, #tpu.memory_space<vmem>>, vector<1x16x384xbf16>
    %58 = vector.shape_cast %57 : vector<1x16x384xbf16> to vector<16x384xbf16>
    %59 = vector.shape_cast %56 : vector<16x384xbf16> to vector<1x16x384xbf16>
    tpu.vector_store %arg4[%c0_49, %c0_50, %c0_51], %59 {strides = array<i32>} : memref<1x16x384xbf16, #tpu.memory_space<vmem>>, vector<1x16x384xbf16>,
    return
  }
  func.func @transform_0(%arg0: i32) -> (i32, i32, i32) {
    %c0_i32 = arith.constant 0 : i32
    %c0_i32_0 = arith.constant 0 : i32
    %c0_i32_1 = arith.constant 0 : i32
    %c0_i32_2 = arith.constant 0 : i32
    return %c0_i32, %c0_i32_0, %c0_i32_1 : i32, i32, i32
  }
  func.func @transform_1(%arg0: i32) -> (i32, i32, i32) {
    %c0_i32 = arith.constant 0 : i32
    %c0_i32_0 = arith.constant 0 : i32
    %c0_i32_1 = arith.constant 0 : i32
    return %arg0, %c0_i32, %c0_i32_0 : i32, i32, i32
  }
  func.func @transform_2(%arg0: i32) -> (i32, i32) {
    %c0_i32 = arith.constant 0 : i32
    %c0_i32_0 = arith.constant 0 : i32
    %c0_i32_1 = arith.constant 0 : i32
    return %c0_i32, %c0_i32_0 : i32, i32
  }
  func.func @transform_3(%arg0: i32) -> (i32, i32, i32) {
    %c0_i32 = arith.constant 0 : i32
    %c0_i32_0 = arith.constant 0 : i32
    %c0_i32_1 = arith.constant 0 : i32
    return %arg0, %c0_i32, %c0_i32_0 : i32, i32, i32
  }
}

</mosaic_0001>

<bundles_post_ra>
// kernel: tpu_custom_call.1
= control target key start
LH: loop header
LB: loop body
LE: loop exit
PB: predicated region body
PF: predicated region fallthrough
CT: control target
= control target key end

     0   :  { %8 = vsyncpa [#allocation3], 0  ;;  %s1519_s0 = inlined_call_operand.vmem [shape: bf16[9,16,4], index: 0, kind: input, shape index: {}]   ;;  %s1520_s1 = inlined_call_operand.vmem [shape: bf16[2,4,512], index: 1, kind: input, shape index: {}]   ;;  %s1521_s2 = inlined_call_operand.vmem [shape: f32[16,1], index: 2, kind: input, shape index: {}]   ;;  %s1522_s3 = inlined_call_operand.hbm [shape: bf16[2,16,384], index: 3, kind: output, shape index: {}]  }
   0x1   :  { %10 = vsyncpa [#allocation3 + $0x1], 0  ;;  %s1309_s12 = smov 0   ;;  %s1311_s13 = smov 0  }
   0x2   :  { %s1313_s14 = smov 0   ;;  %s1315_s15 = smov 0  }
   0x3 LB: > { %s1330_s16 = sadd.s32 4294967295, %s1276_s15   ;;  %s1062_s17 = sadd.s32 4294967294, %s1276_s15   ;;  %s1276_s15 = sphi %s1315_s15, %s1528_s15   ;;  %s1272_s14 = sphi %s1313_s14, %s1527_s14   ;;  %s1268_s13 = sphi %s1311_s13, %s1526_s13   ;;  %s1264_s12 = sphi %s1309_s12, %s1525_s12  }
   0x4   : > { %s1334_s18 = sadd.s32 1, %s1276_s15   ;;  %s91_s19 = sadd.s32 1, %s1272_s14 }
   0x5   : > { %s88_s20 = ssub.s32 %s1276_s15, %s1334_s18  ;;  %p101_p0 = scmp.ne.s32.totalorder %s1272_s14, %s1268_s13 }
   0x6   : > { %p89_p1 = scmp.eq.s32.totalorder %s88_s20, 0  ;;  %p102_p2 = scmp.eq.s32.totalorder %s1330_s16, 1 }
   0x7   : > { %p107_p3 = scmp.ne.s32.totalorder %s1268_s13, %s1264_s12  ;;  %p108_p4 = scmp.eq.s32.totalorder %s1062_s17, 1 }
   0x8   : > { %s1345_s21 = scalar_select %p89_p1, %s1272_s14, %s91_s19  }
   0x9   : > { %p1347_p5 = por %p102_p2, %p101_p0  ;;  %p1351_p6 = por %p108_p4, %p107_p3 }
   0xa   : > { %p1065_p7 = scmp.ge.s32.totalorder %s1276_s15, 1  ;;  %p140_p8 = scmp.lt.s32.totalorder %s1276_s15, 3 }
   0xc   : > { %p141_p9 = pnand %p1065_p7, %p140_p8 }
   0xd   : > { %p164_p10 = scmp.lt.s32.totalorder (!%p141_p9), %s1330_s16, 1  ;;  %s1278_s29 = smov (!%p141_p9), 127  }
   0xe   : > { %144 = sbr.rel (%p141_p9) target bundleno = 409 (0x199), region = 32  ;;  %s1279_s30 = smov (!%p141_p9), 126  }
   0xf   : > { %s1280_s4 = smov (!%p141_p9), 110   ;;  %s1281_s5 = smov (!%p141_p9), 109  }
  0x10   : > { %s1282_s6 = smov (!%p141_p9), 108   ;;  %s1283_s7 = smov (!%p141_p9), 92  }
  0x11   : > { %s1284_s8 = smov (!%p141_p9), 91   ;;  %s1285_s9 = smov (!%p141_p9), 90  }
  0x12   : > { %s161_s20 = sand.u32 (!%p141_p9), 1, %s1268_s13   ;;  %s1161_s26 = smul.u32 (!%p141_p9), 24, %s1330_s16 }
  0x13   : > { %s165_s24 = scalar_select %p164_p10, %s1330_s16, 1  ;;  %vm210_vm0 = vcmask 1041408   ;;  %v1151_v37 = vld [vmem:[%s1519_s0] sm:$0xff]  ;;  %vm206_vm1 = vcmask 31744   ;;  %vm350_vm2 = vcmask 1031168   ;;  %vm202_vm3 = vcmask 1039360  }
  0x14   : > { %v1152_v55 = vld [vmem:[%s1519_s0 + $0x8] sm:$0xff]  ;;  %vm441_vm4 = vcmask 900096   ;;  %v1153_v61 = vld [vmem:[%s1519_s0 + $0x10] sm:$0xff]  ;;  %vm532_vm5 = vcmask 891904   ;;  %vm623_vm6 = vcmask 883712   ;;  %vm714_vm7 = vcmask 752640  }
  0x15   : > { %s1150_s25 = sshll.u32 %s165_s24, 3  ;;  %vm805_vm8 = vcmask 744448   ;;  %vm896_vm9 = vcmask 736256   ;;  %s1160_s24 = smul.u32 24, %s161_s20 }
  0x16   : > { %s168_s28 = scalar_lea.vmem %s1520_s1, %s1150_s25 }
  0x17   : > { %v1362_v0 = vld [vmem:[%s168_s28] sm:$0xff]  ;;  %s163_s25 = scalar_lea.vmem [#allocation2], %s1160_s24 }
  0x18   : > { %185 = vst [vmem:[#allocation1] ss:$4 sm:$0xff] %v1362_v0  ;;  %v172_v1 = vld [vmem:[%s168_s28] sm:$0x3f] }
  0x1f   : > { %v190_v2 = vld.sshfl [vmem:[#allocation1 + $0x10] sm:$0xff pattern:$0x73625140]  ;;  %v186_v3 = vld.sshfl [vmem:[#allocation1] sm:$0xff pattern:$0x73625140] }
  0x20   : > { %198 = vrot.lane.b32.xlu0 %v190_v2, %s1278_s29  ;;  %194 = vrot.lane.b32.xlu1 %v186_v3, %s1278_s29  ;;  %v192_v4 = vld.sshfl [vmem:[#allocation1 + $0x18] sm:$0xff pattern:$0x73625140]  ;;  %v188_v5 = vld.sshfl [vmem:[#allocation1 + $0x8] sm:$0xff pattern:$0x73625140] }
  0x21   : > { %268 = vst [vmem:[#allocation1] ss:$4 sm:$0xff] %v172_v1 }
  0x28   : > { %200 = vrot.lane.b32.xlu0 %v192_v4, %s1278_s29  ;;  %196 = vrot.lane.b32.xlu1 %v188_v5, %s1278_s29  ;;  %v1365_v6 = vld.sshfl [vmem:[#allocation1] sm:$0xff pattern:$0x73625140]  ;;  %v1367_v7 = vld.sshfl [vmem:[#allocation1 + $0x8] sm:$0xff pattern:$0x73625140]  ;;  %s996_s29 = scalar_lea.hbm %s1522_s3, %s1161_s26 }
  0x29   : > { %v1369_v8 = vld.sshfl [vmem:[#allocation1 + $0x10] sm:$0xff pattern:$0x73625140]  ;;  %v275_v35 = vsel %vm210_vm0, %v1365_v6, 0  ;;  %v277_v46 = vsel %vm210_vm0, %v1367_v7, 0  ;;  %s999_s16 = sshll.u32 %s996_s29, 4  ;;  %s1000_s16 = int_to_ptr.hbm [resolvable:$true] %s999_s16 }
  0x2a   : > { %333 = vst [vmem:[#allocation1] ss:$4 sm:$0xff] %v1362_v0  ;;  %288 = vmatpush.bf16.msra.mxu3 %v275_v35  ;;  %v279_v50 = vsel %vm210_vm0, %v1369_v8, 0 }
  0x2d   : > { %1081 = vmatmul.msk.bf16.vlgmr.msra.gmra.mxu3 %vm206_vm1, %v1151_v37 }
  0x31   : > { %v336_v9 = vld.sshfl [vmem:[#allocation1 + $0x8] sm:$0xff pattern:$0x73625140]  ;;  %v340_v10 = vld.sshfl [vmem:[#allocation1 + $0x18] sm:$0xff pattern:$0x73625140] }
  0x32   : > { %v338_v11 = vld.sshfl [vmem:[#allocation1 + $0x10] sm:$0xff pattern:$0x73625140]  ;;  %v334_v12 = vld.sshfl [vmem:[#allocation1] sm:$0xff pattern:$0x73625140] }
  0x33   : > { %346 = vrot.lane.b32.xlu0 %v338_v11, %s1279_s30  ;;  %342 = vrot.lane.b32.xlu2 %v334_v12, %s1279_s30  ;;  %424 = vst [vmem:[#allocation1] ss:$4 sm:$0xff] %v1362_v0  ;;  %v1154_v12 = vld [vmem:[%s1519_s0 + $0x18] sm:$0xff] }
  0x3a   : > { %v427_v13 = vld.sshfl [vmem:[#allocation1 + $0x8] sm:$0xff pattern:$0x73625140]  ;;  %v429_v14 = vld.sshfl [vmem:[#allocation1 + $0x10] sm:$0xff pattern:$0x73625140] }
  0x3b   : > { %v431_v15 = vld.sshfl [vmem:[#allocation1 + $0x18] sm:$0xff pattern:$0x73625140]  ;;  %435 = vrot.lane.b32.xlu1 %v427_v13, %s1280_s4  ;;  %348 = vrot.lane.b32.xlu0 %v340_v10, %s1279_s30  ;;  %v425_v16 = vld.sshfl [vmem:[#allocation1] sm:$0xff pattern:$0x73625140] }
  0x3c   : > { %344 = vrot.lane.b32.xlu2 %v336_v9, %s1279_s30  ;;  %515 = vst [vmem:[#allocation1] ss:$4 sm:$0xff] %v1362_v0  ;;  %s997_s30 = sshll.u32 %s163_s25, 4  ;;  %s998_s30 = int_to_ptr.vmem [resolvable:$true] %s997_s30 }
  0x43   : > { %433 = vrot.lane.b32.xlu1 %v425_v16, %s1280_s4  ;;  %v520_v17 = vld.sshfl [vmem:[#allocation1 + $0x10] sm:$0xff pattern:$0x73625140]  ;;  %v516_v18 = vld.sshfl [vmem:[#allocation1] sm:$0xff pattern:$0x73625140] }
  0x44   : > { %528 = vrot.lane.b32.xlu0 %v520_v17, %s1281_s5  ;;  %v522_v19 = vld.sshfl [vmem:[#allocation1 + $0x18] sm:$0xff pattern:$0x73625140]  ;;  %v518_v20 = vld.sshfl [vmem:[#allocation1 + $0x8] sm:$0xff pattern:$0x73625140]  ;;  %437 = vrot.lane.b32.xlu2 %v429_v14, %s1280_s4 }
  0x45   : > { %606 = vst [vmem:[#allocation1] ss:$4 sm:$0xff] %v1362_v0 }
  0x4b   : > { %530 = vrot.lane.b32.xlu1 %v522_v19, %s1281_s5 }
  0x4c   : > { %526 = vrot.lane.b32.xlu0 %v518_v20, %s1281_s5  ;;  %v609_v21 = vld.sshfl [vmem:[#allocation1 + $0x8] sm:$0xff pattern:$0x73625140]  ;;  %v611_v22 = vld.sshfl [vmem:[#allocation1 + $0x10] sm:$0xff pattern:$0x73625140]  ;;  %439 = vrot.lane.b32.xlu2 %v431_v15, %s1280_s4 }
  0x4d   : > { %v613_v23 = vld.sshfl [vmem:[#allocation1 + $0x18] sm:$0xff pattern:$0x73625140]  ;;  %v607_v24 = vld.sshfl [vmem:[#allocation1] sm:$0xff pattern:$0x73625140] }
  0x4e   : > { %697 = vst [vmem:[#allocation1] ss:$4 sm:$0xff] %v1362_v0  ;;  %s985_s4 = scalar_lea.sflag [#allocation3], %s161_s20 }
  0x53   : > { %615 = vrot.lane.b32.xlu1 %v607_v24, %s1282_s6 }
  0x54   : > { %524 = vrot.lane.b32.xlu2 %v516_v18, %s1281_s5  ;;  %s1228_s5 = sshra.s32 %s1000_s16, 4  ;;  %s1229_s5 = int_to_ptr.hbm [resolvable:$true] %s1228_s5 }
  0x55   : > { %v704_v25 = vld.sshfl [vmem:[#allocation1 + $0x18] sm:$0xff pattern:$0x73625140]  ;;  %v698_v26 = vld.sshfl [vmem:[#allocation1] sm:$0xff pattern:$0x73625140]  ;;  %p1235_p0 = scmp.lt.s32.totalorder %s1229_s5, %s1522_s3 }
  0x56   : > { %706 = vrot.lane.b32.xlu0 %v698_v26, %s1283_s7  ;;  %v700_v27 = vld.sshfl [vmem:[#allocation1 + $0x8] sm:$0xff pattern:$0x73625140]  ;;  %v702_v28 = vld.sshfl [vmem:[#allocation1 + $0x10] sm:$0xff pattern:$0x73625140] }
  0x57   : > { %788 = vst [vmem:[#allocation1] ss:$4 sm:$0xff] %v1362_v0 }
  0x5b   : > { %708 = vrot.lane.b32.xlu1 %v700_v27, %s1283_s7 }
  0x5c   : > { %617 = vrot.lane.b32.xlu2 %v609_v21, %s1282_s6 }
  0x5e   : > { %621 = vrot.lane.b32.xlu0 %v613_v23, %s1282_s6  ;;  %v789_v29 = vld.sshfl [vmem:[#allocation1] sm:$0xff pattern:$0x73625140]  ;;  %v791_v30 = vld.sshfl [vmem:[#allocation1 + $0x8] sm:$0xff pattern:$0x73625140] }
  0x5f   : > { %v793_v31 = vld.sshfl [vmem:[#allocation1 + $0x10] sm:$0xff pattern:$0x73625140]  ;;  %v795_v32 = vld.sshfl [vmem:[#allocation1 + $0x18] sm:$0xff pattern:$0x73625140] }
  0x60   : > { %879 = vst [vmem:[#allocation1] ss:$4 sm:$0xff] %v1362_v0 }
  0x63   : > { %710 = vrot.lane.b32.xlu1 %v702_v28, %s1283_s7  ;;  %v1156_v28 = vld [vmem:[%s1519_s0 + $0x28] sm:$0xff] }
  0x64   : > { %619 = vrot.lane.b32.xlu2 %v611_v22, %s1282_s6  ;;  %s1230_s6 = scalar_lea.hbm %s1229_s5, 24 }
  0x65   : > { %p1231_p11 = scmp.ne.s32.totalorder %s1229_s5, %s1230_s6 }
  0x66   : > { %801 = vrot.lane.b32.xlu0 %v793_v31, %s1284_s8  ;;  %v1155_v31 = vld [vmem:[%s1519_s0 + $0x20] sm:$0xff] }
  0x67   : > { %v884_v33 = vld.sshfl [vmem:[#allocation1 + $0x10] sm:$0xff pattern:$0x73625140]  ;;  %v880_v34 = vld.sshfl [vmem:[#allocation1] sm:$0xff pattern:$0x73625140]  ;;  %p1232_p12 = pnand %p1231_p11, %p1347_p5 }
  0x68   : > { %v882_v36 = vld.sshfl [vmem:[#allocation1 + $0x8] sm:$0xff pattern:$0x73625140]  ;;  %v886_v38 = vld.sshfl [vmem:[#allocation1 + $0x18] sm:$0xff pattern:$0x73625140] }
  0x69   : > { %p1233_p13 = pneg %p1232_p12 }
  0x6b   : > { %712 = vrot.lane.b32.xlu1 %v704_v25, %s1283_s7 }
  0x6c   : > { %799 = vrot.lane.b32.xlu2 %v791_v30, %s1284_s8 }
  0x6e   : > { %803 = vrot.lane.b32.xlu0 %v795_v32, %s1284_s8 }
  0x73   : > { %892 = vrot.lane.b32.xlu1 %v884_v33, %s1285_s9 }
  0x74   : > { %797 = vrot.lane.b32.xlu2 %v789_v29, %s1284_s8 }
  0x76   : > { %888 = vrot.lane.b32.xlu0 %v880_v34, %s1285_s9 }
  0x7b   : > { %890 = vrot.lane.b32.xlu1 %v882_v36, %s1285_s9 }
  0x7c   : > { %894 = vrot.lane.b32.xlu2 %v886_v38, %s1285_s9  ;;  %s1234_s9 = scalar_lea.hbm %s1522_s3, 48 }
  0x7d   : > { %p1236_p1 = scmp.lt.s32.totalorder %s1234_s9, %s1230_s6 }
  0x7f   : > { %p1237_p2 = por %p1236_p1, %p1235_p0 }
  0x81   : > { %p1238_p3 = pnand %p1237_p2, %p1233_p13 }
  0x8d   : > { %v343_v39 = vpop.permute.xlu2 %342 }
  0x92   : > { %v199_v40 = vpop.permute.xlu0 %198  ;;  %v195_v41 = vpop.permute.xlu1 %194 }
  0x96   : > { %v345_v42 = vpop.permute.xlu2 %344 }
  0x97   : > { %v351_v43 = vsel %vm350_vm2, %v343_v39, %v345_v42 }
  0x98   : > { %v358_v54 = vsel %vm210_vm0, %v351_v43, 0  ;;  %v1157_v43 = vld [vmem:[%s1519_s0 + $0x30] sm:$0xff] }
  0x9a   : > { %v201_v44 = vpop.permute.xlu0 %200  ;;  %v197_v45 = vpop.permute.xlu1 %196 }
  0x9b   : > { %v203_v47 = vsel %vm202_vm3, %v195_v41, %v197_v45  ;;  %v204_v48 = vsel %vm202_vm3, %v197_v45, %v199_v40  ;;  %v205_v49 = vsel %vm202_vm3, %v199_v40, %v201_v44 }
  0x9c   : > { %v212_v51 = vsel %vm210_vm0, %v203_v47, 0  ;;  %v215_v52 = vsel %vm210_vm0, %v204_v48, 0  ;;  %v218_v53 = vsel %vm210_vm0, %v205_v49, 0 }
  0x9d   : > { %227 = vmatpush.bf16.msra.mxu0 %v212_v51  ;;  %241 = vmatpush.bf16.msra.mxu1 %v215_v52 }
  0x9e   : > { %255 = vmatpush.bf16.msra.mxu2 %v218_v53  ;;  %v438_v56 = vpop.permute.xlu2 %437  ;;  %v171_v53 = vld [vmem:[%s1521_s2 + $0x8] sm:$0xff] }
  0xa0   : > { %1074 = vmatmul.msk.bf16.vlgmr.msra.gmra.mxu0 %vm206_vm1, %v1152_v55  ;;  %1075 = vmatmul.msk.bf16.vlgmr.msra.gmra.mxu1 %vm206_vm1, %v1152_v55 }
  0xa1   : > { %302 = vmatpush.bf16.msrb.mxu0 %v277_v46  ;;  %316 = vmatpush.bf16.msrb.mxu1 %v279_v50 }
  0xa2   : > { %373 = vmatpush.bf16.msrb.mxu2 %v358_v54 }
  0xa3   : > { %1076 = vmatmul.msk.bf16.vlgmr.msra.gmra.mxu2 %vm206_vm1, %v1152_v55  ;;  %v1286_v55 = vmov 0  }
  0xa4   : > { %1213 = vset.pattern.permute.xlu0 %v1286_v55  ;;  %1212 = vset.pattern.permute.xlu2 %v1286_v55 }
  0xa5   : > { %v347_v57 = vpop.permute.xlu0 %346  ;;  %967 = vperm.xlu0 %1213, %v171_v53  }
  0xa6   : > { %v352_v58 = vsel %vm350_vm2, %v345_v42, %v347_v57  ;;  %v440_v59 = vpop.permute.xlu2 %439 }
  0xa7   : > { %v361_v60 = vsel %vm210_vm0, %v352_v58, 0  ;;  %v444_v62 = vsel %vm441_vm4, %v438_v56, %v440_v59  ;;  %v1158_v59 = vld [vmem:[%s1519_s0 + $0x38] sm:$0xff] }
  0xa8   : > { %387 = vmatpush.bf16.msrb.mxu3 %v361_v60  ;;  %v455_v63 = vsel %vm210_vm0, %v444_v62, 0 }
  0xab   : > { %1091 = vmatmul.msk.bf16.vlgmr.msrb.gmra.mxu3 %vm206_vm1, %v1153_v61 }
  0xac   : > { %492 = vmatpush.bf16.msra.mxu3 %v455_v63 }
  0xad   : > { %v436_v0 = vpop.permute.xlu1 %435  ;;  %v349_v1 = vpop.permute.xlu0 %348 }
  0xae   : > { %v443_v2 = vsel %vm441_vm4, %v436_v0, %v438_v56  ;;  %v353_v3 = vsel %vm350_vm2, %v347_v57, %v349_v1  ;;  %v525_v4 = vpop.permute.xlu2 %524 }
  0xaf   : > { %v452_v5 = vsel %vm210_vm0, %v443_v2, 0  ;;  %v364_v6 = vsel %vm210_vm0, %v353_v3, 0  ;;  %v1159_v2 = vld [vmem:[%s1519_s0 + $0x40] sm:$0xff] }
  0xb0   : > { %401 = vmatpush.bf16.msra.mxu0 %v364_v6  ;;  %478 = vmatpush.bf16.msra.mxu2 %v452_v5  ;;  %v170_v3 = vld [vmem:[%s1521_s2] sm:$0xff] }
  0xb1   : > { %1082 = vmatmul.msk.bf16.vlgmr.msrb.gmra.mxu0 %vm206_vm1, %v1151_v37  ;;  %1083 = vmatmul.msk.bf16.vlgmr.msrb.gmra.mxu1 %vm206_vm1, %v1151_v37 }
  0xb2   : > { %962 = vperm.xlu2 %1212, %v170_v3  }
  0xb3   : > { %1090 = vmatmul.msk.bf16.vlgmr.msrb.gmra.mxu2 %vm206_vm1, %v1153_v61 }
  0xb5   : > { %v434_v7 = vpop.permute.xlu1 %433 }
  0xb6   : > { %v442_v8 = vsel %vm441_vm4, %v434_v7, %v436_v0  ;;  %v529_v9 = vpop.permute.xlu0 %528  ;;  %v618_v10 = vpop.permute.xlu2 %617 }
  0xb7   : > { %v449_v11 = vsel %vm210_vm0, %v442_v8, 0 }
  0xb8   : > { %464 = vmatpush.bf16.msra.mxu1 %v449_v11 }
  0xbb   : > { %1101 = vmatmul.msk.bf16.vlgmr.msra.gmra.mxu3 %vm206_vm1, %v1154_v12 }
  0xbd   : > { %v531_v13 = vpop.permute.xlu1 %530 }
  0xbe   : > { %v535_v14 = vsel %vm532_vm5, %v529_v9, %v531_v13  ;;  %v527_v15 = vpop.permute.xlu0 %526  ;;  %v620_v16 = vpop.permute.xlu2 %619 }
  0xbf   : > { %v546_v17 = vsel %vm210_vm0, %v535_v14, 0  ;;  %v534_v18 = vsel %vm532_vm5, %v527_v15, %v529_v9  ;;  %v533_v19 = vsel %vm532_vm5, %v525_v4, %v527_v15  ;;  %v625_v20 = vsel %vm623_vm6, %v618_v10, %v620_v16  ;;  %v290_v4 = vpop.f32.mrf.mxu3 }
  0xc0   : > { %v543_v21 = vsel %vm210_vm0, %v534_v18, 0  ;;  %v540_v22 = vsel %vm210_vm0, %v533_v19, 0  ;;  %583 = vmatpush.bf16.msrb.mxu2 %v546_v17  ;;  %v634_v23 = vsel %vm210_vm0, %v625_v20, 0 }
  0xc1   : > { %569 = vmatpush.bf16.msrb.mxu1 %v543_v21  ;;  %1092 = vmatmul.msk.bf16.vlgmr.msra.gmra.mxu0 %vm206_vm1, %v1153_v61 }
  0xc2   : > { %1099 = vmatmul.msk.bf16.vlgmr.msra.gmra.mxu1 %vm206_vm1, %v1154_v12  ;;  %555 = vmatpush.bf16.msrb.mxu0 %v540_v22 }
  0xc3   : > { %1100 = vmatmul.msk.bf16.vlgmr.msra.gmra.mxu2 %vm206_vm1, %v1154_v12 }
  0xc5   : > { %v616_v24 = vpop.permute.xlu1 %615 }
  0xc6   : > { %660 = vmatpush.bf16.msra.mxu0 %v634_v23  ;;  %v624_v25 = vsel %vm623_vm6, %v616_v24, %v618_v10  ;;  %v800_v26 = vpop.permute.xlu2 %799 }
  0xc7   : > { %v631_v27 = vsel %vm210_vm0, %v624_v25, 0  ;;  %v292_v10 = vpop.f32.mrf.mxu3 }
  0xc8   : > { %v707_v29 = vpop.permute.xlu0 %706  ;;  %646 = vmatpush.bf16.msrb.mxu3 %v631_v27 }
  0xcb   : > { %1117 = vmatmul.msk.bf16.vlgmr.msrb.gmra.mxu3 %vm206_vm1, %v1156_v28 }
  0xcd   : > { %v709_v30 = vpop.permute.xlu1 %708 }
  0xce   : > { %v715_v32 = vsel %vm714_vm7, %v707_v29, %v709_v30  ;;  %v798_v33 = vpop.permute.xlu2 %797 }
  0xcf   : > { %v722_v34 = vsel %vm210_vm0, %v715_v32, 0  ;;  %v806_v35 = vsel %vm805_vm8, %v798_v33, %v800_v26 }
  0xd0   : > { %v622_v36 = vpop.permute.xlu0 %621  ;;  %737 = vmatpush.bf16.msra.mxu2 %v722_v34  ;;  %v813_v38 = vsel %vm210_vm0, %v806_v35, 0 }
  0xd1   : > { %v626_v37 = vsel %vm623_vm6, %v620_v16, %v622_v36  ;;  %1108 = vmatmul.msk.bf16.vlgmr.msrb.gmra.mxu0 %vm206_vm1, %v1155_v31 }
  0xd2   : > { %v637_v39 = vsel %vm210_vm0, %v626_v37, 0  ;;  %1109 = vmatmul.msk.bf16.vlgmr.msrb.gmra.mxu1 %vm206_vm1, %v1155_v31 }
  0xd3   : > { %1110 = vmatmul.msk.bf16.vlgmr.msrb.gmra.mxu2 %vm206_vm1, %v1155_v31  ;;  %674 = vmatpush.bf16.msra.mxu1 %v637_v39 }
  0xd5   : > { %v711_v40 = vpop.permute.xlu1 %710 }
  0xd6   : > { %v716_v41 = vsel %vm714_vm7, %v709_v30, %v711_v40  ;;  %v895_v54 = vpop.permute.xlu2 %894 }
  0xd7   : > { %828 = vmatpush.bf16.msrb.mxu1 %v813_v38  ;;  %v725_v42 = vsel %vm210_vm0, %v716_v41, 0 }
  0xd8   : > { %v802_v44 = vpop.permute.xlu0 %801  ;;  %751 = vmatpush.bf16.msra.mxu3 %v725_v42 }
  0xd9   : > { %v807_v45 = vsel %vm805_vm8, %v800_v26, %v802_v44 }
  0xda   : > { %v816_v46 = vsel %vm210_vm0, %v807_v45, 0 }
  0xdb   : > { %1127 = vmatmul.msk.bf16.vlgmr.msra.gmra.mxu3 %vm206_vm1, %v1157_v43  ;;  %842 = vmatpush.bf16.msrb.mxu2 %v816_v46 }
  0xdd   : > { %v713_v47 = vpop.permute.xlu1 %712 }
  0xde   : > { %v717_v48 = vsel %vm714_vm7, %v711_v40, %v713_v47 }
  0xdf   : > { %v728_v49 = vsel %vm210_vm0, %v717_v48, 0 }
  0xe0   : > { %v804_v50 = vpop.permute.xlu0 %803  ;;  %765 = vmatpush.bf16.msrb.mxu0 %v728_v49 }
  0xe1   : > { %v808_v51 = vsel %vm805_vm8, %v802_v44, %v804_v50  ;;  %1118 = vmatmul.msk.bf16.vlgmr.msra.gmra.mxu0 %vm206_vm1, %v1156_v28 }
  0xe2   : > { %v819_v52 = vsel %vm210_vm0, %v808_v51, 0  ;;  %1119 = vmatmul.msk.bf16.vlgmr.msra.gmra.mxu1 %vm206_vm1, %v1156_v28 }
  0xe3   : > { %1126 = vmatmul.msk.bf16.vlgmr.msra.gmra.mxu2 %vm206_vm1, %v1157_v43  ;;  %856 = vmatpush.bf16.msrb.mxu3 %v819_v52 }
  0xe5   : > { %v893_v56 = vpop.permute.xlu1 %892 }
  0xe6   : > { %v899_v57 = vsel %vm896_vm9, %v893_v56, %v895_v54 }
  0xe7   : > { %v910_v58 = vsel %vm210_vm0, %v899_v57, 0 }
  0xe8   : > { %947 = vmatpush.bf16.msra.mxu2 %v910_v58  ;;  %v889_v60 = vpop.permute.xlu0 %888 }
  0xeb   : > { %1137 = vmatmul.msk.bf16.vlgmr.msrb.gmra.mxu3 %vm206_vm1, %v1158_v59 }
  0xed   : > { %v891_v61 = vpop.permute.xlu1 %890 }
  0xee   : > { %v898_v62 = vsel %vm896_vm9, %v891_v61, %v893_v56  ;;  %v897_v63 = vsel %vm896_vm9, %v889_v60, %v891_v61 }
  0xef   : > { %v907_v0 = vsel %vm210_vm0, %v898_v62, 0  ;;  %v904_v1 = vsel %vm210_vm0, %v897_v63, 0 }
  0xf0   : > { %933 = vmatpush.bf16.msra.mxu1 %v907_v0  ;;  %919 = vmatpush.bf16.msra.mxu0 %v904_v1 }
  0xf1   : > { %1128 = vmatmul.msk.bf16.vlgmr.msrb.gmra.mxu0 %vm206_vm1, %v1157_v43 }
  0xf2   : > { %1135 = vmatmul.msk.bf16.vlgmr.msrb.gmra.mxu1 %vm206_vm1, %v1158_v59 }
  0xf3   : > { %1136 = vmatmul.msk.bf16.vlgmr.msrb.gmra.mxu2 %vm206_vm1, %v1158_v59 }
 0x101   : > { %1144 = vmatmul.msk.bf16.vlgmr.msra.gmra.mxu0 %vm206_vm1, %v1159_v2 }
 0x102   : > { %1145 = vmatmul.msk.bf16.vlgmr.msra.gmra.mxu1 %vm206_vm1, %v1159_v2 }
 0x103   : > { %1146 = vmatmul.msk.bf16.vlgmr.msra.gmra.mxu2 %vm206_vm1, %v1159_v2 }
 0x11d   : > { %v229_v5 = vpop.f32.mrf.mxu0  ;;  %v243_v6 = vpop.f32.mrf.mxu1 }
 0x11e   : > { %v291_v48 = vadd.f32 %v290_v4, %v229_v5 }
 0x125   : > { %v231_v8 = vpop.f32.mrf.mxu0  ;;  %v245_v9 = vpop.f32.mrf.mxu1 }
 0x126   : > { %v257_v7 = vpop.f32.mrf.mxu2  ;;  %v293_v60 = vadd.f32 %v292_v10, %v231_v8 }
 0x12e   : > { %v259_v11 = vpop.f32.mrf.mxu2  ;;  %v304_v12 = vpop.f32.mrf.mxu0 }
 0x12f   : > { %v318_v13 = vpop.f32.mrf.mxu1  ;;  %v305_v14 = vadd.f32 %v304_v12, %v243_v6  ;;  %v389_v16 = vpop.f32.mrf.mxu3 }
 0x130   : > { %v319_v15 = vadd.f32 %v318_v13, %v257_v7 }
 0x131   : > { %v409_v51 = vadd.f32 %v389_v16, %v305_v14  ;;  %v963_v16 = vpop.permute.xlu2 %962 }
 0x136   : > { %v375_v17 = vpop.f32.mrf.mxu2  ;;  %v306_v18 = vpop.f32.mrf.mxu0 }
 0x137   : > { %v320_v19 = vpop.f32.mrf.mxu1  ;;  %v307_v20 = vadd.f32 %v306_v18, %v245_v9  ;;  %v391_v22 = vpop.f32.mrf.mxu3  ;;  %v408_v50 = vadd.f32 %v375_v17, %v291_v48 }
 0x138   : > { %v321_v21 = vadd.f32 %v320_v19, %v259_v11 }
 0x139   : > { %v412_v1 = vadd.f32 %v391_v22, %v307_v20 }
 0x13e   : > { %v377_v23 = vpop.f32.mrf.mxu2  ;;  %v403_v24 = vpop.f32.mrf.mxu0 }
 0x13f   : > { %v466_v25 = vpop.f32.mrf.mxu1  ;;  %v494_v26 = vpop.f32.mrf.mxu3  ;;  %v410_v57 = vadd.f32 %v403_v24, %v319_v15  ;;  %v411_v63 = vadd.f32 %v377_v23, %v293_v60 }
 0x140   : > { %v499_v52 = vadd.f32 %v466_v25, %v408_v50 }
 0x141   : > { %v501_v2 = vadd.f32 %v494_v26, %v410_v57 }
 0x146   : > { %v480_v27 = vpop.f32.mrf.mxu2  ;;  %v405_v28 = vpop.f32.mrf.mxu0 }
 0x147   : > { %v468_v29 = vpop.f32.mrf.mxu1  ;;  %v496_v30 = vpop.f32.mrf.mxu3  ;;  %v500_v53 = vadd.f32 %v480_v27, %v409_v51  ;;  %v413_v13 = vadd.f32 %v405_v28, %v321_v21 }
 0x148   : > { %v502_v3 = vadd.f32 %v468_v29, %v411_v63 }
 0x149   : > { %v504_v26 = vadd.f32 %v496_v30, %v413_v13 }
 0x14e   : > { %v482_v31 = vpop.f32.mrf.mxu2  ;;  %v557_v32 = vpop.f32.mrf.mxu0 }
 0x14f   : > { %v571_v33 = vpop.f32.mrf.mxu1  ;;  %v648_v36 = vpop.f32.mrf.mxu3  ;;  %v590_v54 = vadd.f32 %v557_v32, %v499_v52  ;;  %v503_v5 = vadd.f32 %v482_v31, %v412_v1 }
 0x150   : > { %v591_v58 = vadd.f32 %v571_v33, %v500_v53 }
 0x151   : > { %v681_v0 = vadd.f32 %v648_v36, %v590_v54 }
 0x156   : > { %v585_v34 = vpop.f32.mrf.mxu2  ;;  %v559_v35 = vpop.f32.mrf.mxu0 }
 0x157   : > { %v573_v37 = vpop.f32.mrf.mxu1  ;;  %v650_v41 = vpop.f32.mrf.mxu3  ;;  %v592_v6 = vadd.f32 %v585_v34, %v501_v2  ;;  %v593_v9 = vadd.f32 %v559_v35, %v502_v3 }
 0x158   : > { %v594_v14 = vadd.f32 %v573_v37, %v503_v5 }
 0x159   : > { %v684_v24 = vadd.f32 %v650_v41, %v593_v9 }
 0x15e   : > { %v587_v38 = vpop.f32.mrf.mxu2  ;;  %v662_v39 = vpop.f32.mrf.mxu0 }
 0x15f   : > { %v676_v40 = vpop.f32.mrf.mxu1  ;;  %v753_v45 = vpop.f32.mrf.mxu3  ;;  %v682_v62 = vadd.f32 %v662_v39, %v591_v58  ;;  %v595_v21 = vadd.f32 %v587_v38, %v504_v26 }
 0x160   : > { %v683_v15 = vadd.f32 %v676_v40, %v592_v6  ;;  %v968_v40 = vpop.permute.xlu0 %967 }
 0x161   : > { %v773_v7 = vadd.f32 %v753_v45, %v682_v62 }
 0x166   : > { %v739_v42 = vpop.f32.mrf.mxu2  ;;  %v664_v43 = vpop.f32.mrf.mxu0 }
 0x167   : > { %v678_v44 = vpop.f32.mrf.mxu1  ;;  %v755_v55 = vpop.f32.mrf.mxu3  ;;  %v772_v4 = vadd.f32 %v739_v42, %v681_v0  ;;  %v685_v20 = vadd.f32 %v664_v43, %v594_v14 }
 0x168   : > { %v686_v35 = vadd.f32 %v678_v44, %v595_v21 }
 0x169   : > { %v776_v28 = vadd.f32 %v755_v55, %v685_v20 }
 0x16e   : > { %v741_v46 = vpop.f32.mrf.mxu2  ;;  %v767_v47 = vpop.f32.mrf.mxu0 }
 0x16f   : > { %v830_v49 = vpop.f32.mrf.mxu1  ;;  %v858_v17 = vpop.f32.mrf.mxu3  ;;  %v774_v22 = vadd.f32 %v767_v47, %v683_v15  ;;  %v775_v29 = vadd.f32 %v741_v46, %v684_v24 }
 0x170   : > { %v863_v11 = vadd.f32 %v830_v49, %v772_v4 }
 0x171   : > { %v865_v31 = vadd.f32 %v858_v17, %v774_v22 }
 0x176   : > { %v844_v56 = vpop.f32.mrf.mxu2  ;;  %v769_v59 = vpop.f32.mrf.mxu0 }
 0x177   : > { %v832_v61 = vpop.f32.mrf.mxu1  ;;  %v864_v8 = vadd.f32 %v844_v56, %v773_v7  ;;  %v777_v30 = vadd.f32 %v769_v59, %v686_v35  ;;  %v860_v46 = vpop.f32.mrf.mxu3 }
 0x178   : > { %v866_v33 = vadd.f32 %v832_v61, %v775_v29 }
 0x179   : > { %v868_v44 = vadd.f32 %v860_v46, %v777_v30 }
 0x17e   : > { %v846_v12 = vpop.f32.mrf.mxu2  ;;  %v921_v10 = vpop.f32.mrf.mxu0 }
 0x17f   : > { %v954_v18 = vadd.f32 %v921_v10, %v863_v11  ;;  %v935_v19 = vpop.f32.mrf.mxu1  ;;  %v867_v36 = vadd.f32 %v846_v12, %v776_v28 }
 0x180   : > { %v955_v23 = vadd.f32 %v935_v19, %v864_v8 }
 0x181   : > { %v970_v25 = vadd.f32 %v963_v16, %v954_v18 }
 0x182   : > { %v971_v27 = vadd.f32 %v963_v16, %v955_v23 }
 0x184   : > { %v976_v32 = vpack.c.bf16 %v971_v27, %v970_v25 }
 0x186   : > { %v949_v34 = vpop.f32.mrf.mxu2  ;;  %980 = vst [vmem:[%s163_s25] sm:$0xff] %v976_v32  ;;  %v923_v39 = vpop.f32.mrf.mxu0 }
 0x187   : > { %v956_v37 = vadd.f32 %v949_v34, %v865_v31  ;;  %v957_v42 = vadd.f32 %v923_v39, %v866_v33  ;;  %v937_v41 = vpop.f32.mrf.mxu1 }
 0x188   : > { %v958_v45 = vadd.f32 %v937_v41, %v867_v36 }
 0x189   : > { %v972_v43 = vadd.f32 %v963_v16, %v956_v37  ;;  %v973_v38 = vadd.f32 %v968_v40, %v957_v42 }
 0x18a   : > { %v974_v48 = vadd.f32 %v968_v40, %v958_v45 }
 0x18b   : > { %v977_v47 = vpack.c.bf16 %v972_v43, %v972_v43 }
 0x18c   : > { %v978_v49 = vpack.c.bf16 %v974_v48, %v973_v38 }
 0x18d   : > { %981 = vst [vmem:[%s163_s25 + $0x8] sm:$0xf] %v977_v47 }
 0x18e   : > { %v951_v50 = vpop.f32.mrf.mxu2  ;;  %982 = vst [vmem:[%s163_s25 + $0xc] sm:$0xff] %v978_v49 }
 0x18f   : > { %v959_v51 = vadd.f32 %v951_v50, %v868_v44 }
 0x191   : > { %v975_v52 = vadd.f32 %v968_v40, %v959_v51 }
 0x193   : > { %v979_v53 = vpack.c.bf16 %v975_v52, %v975_v52 }
 0x195   : > { %983 = vst [vmem:[%s163_s25 + $0x14] sm:$0xf] %v979_v53 }
 0x196   : > { %1241 = shalt.err (!%p1238_p3)
}
 0x197   : > { %s1287_s17 = smov 192   ;;  %s1288_s19 = smov 12  }
 0x198   : > { %1162 = dma.vmem_to_hbm [thread:$0]  (%p1347_p5), %s998_s30, 384, %s1000_s16, %s985_s4, %s1287_s17, %s1287_s17, %s1288_s19  }
 0x199 PF: > { %p1168_p4 = scmp.ge.s32.totalorder %s1276_s15, 2  ;;  %s1014_s20 = sand.u32 1, %s1264_s12  }
 0x19a   : > { %s1015_s24 = scalar_lea.sflag [#allocation3], %s1014_s20 }
 0x19b   : > { %p1165_p7 = pnand %p1168_p4, %p1351_p6 }
 0x19d   : > { %p1166_p8 = pneg %p1165_p7 }
 0x19f   : > { %1259 = dma.done.wait (%p1166_p8), %s1015_s24, 384  }
 0x1a0   : > { %1261 = vsyncadd (%p1166_p8), %s1015_s24, 4294966912  ;;  %p13_p9 = scmp.ge.s32.totalorder %s1334_s18, 4   ;;  %s1525_s12 = smov %s1268_s13 }
 0x1a1   : > { %s1526_s13 = smov %s1272_s14  ;;  %s1527_s14 = smov %s1345_s21 }
 0x1a2   : > { %s1528_s15 = smov %s1334_s18  ;;  %15 = sbr.rel (!%p13_p9) target bundleno = 3 (0x3), region = 75 }
 0x1a7   :  { %1021 = vsyncpa [#allocation3], 1 }
 0x1a8   :  { %1023 = vsyncpa [#allocation3 + $0x1], 1 }

</bundles_post_ra>
